<compile_context>
chip_gen: v5e
topology: v5e:2x2
jax: 0.10.0
libtpu: 0.0.40
codegen_flags: <defaults>
</compile_context>

<pallas_src>
import functools
import math

import jax
import jax.numpy as jnp
from jax.experimental import pallas as pl
from jax.experimental.pallas import tpu as pltpu


def make_pe_table(d_model: int, max_len: int) -> jax.Array:
    """Deterministic positional-encoding buffer, shape (max_len, 1, d_model)."""
    assert d_model % 2 == 0, "even d_model required (same constraint as the torch module)"
    position = jnp.arange(0, max_len, dtype=jnp.float32)[:, None]            # (L, 1)
    div_term = jnp.exp(
        jnp.arange(0, d_model, 2, dtype=jnp.float32) * (-math.log(10000.0) / d_model)
    )                                                                        # (D/2,)
    args = position * div_term                                               # (L, D/2)
    pe = jnp.zeros((max_len, d_model), dtype=jnp.float32)
    pe = pe.at[:, 0::2].set(jnp.sin(args))
    pe = pe.at[:, 1::2].set(jnp.cos(args))
    # pe.unsqueeze(0).transpose(0, 1) in torch  ->  (max_len, 1, d_model)
    return pe[:, None, :]


def _pe_kernel(*refs, batch: int, d_model: int, p: float, train: bool):
    # Eval:  (x_ref, pe_ref, o_ref)
    # Train: (x_ref, pe_ref, bits_ref, o_ref)   bits: uint8 uniform in [0, 256)
    if train:
        x_ref, pe_ref, bits_ref, o_ref = refs
    else:
        x_ref, pe_ref, o_ref = refs
        bits_ref = None

    pe_t = pe_ref[...]                                   # (tile_s, D), already x dtype
    if train:
        # Inverted dropout: drop w.p. ~p (8-bit threshold resolution),
        # keep -> scale by 1/(1-p).  Matches torch.nn.Dropout semantics but is
        # NOT bit-identical to torch's RNG stream.
        thr = min(max(int(round(p * 256.0)), 0), 256)
        scale = jnp.asarray(1.0 / (1.0 - p), dtype=o_ref.dtype)

    # Static per-batch lane slices are free ref views: no lane-axis tile/concat
    # (no XLU work) and no full-width broadcast temporary.
    for b in range(batch):
        sl = slice(b * d_model, (b + 1) * d_model)
        y = x_ref[:, sl] + pe_t
        if train:
            bits = bits_ref[:, sl].astype(jnp.int32)     # 0..255
            keep = bits >= thr                           # keep prob ~= 1 - p
            y = jnp.where(keep, y * scale, jnp.zeros_like(y))
        o_ref[:, sl] = y


# Conservative, generation-agnostic budgets: safe on v5e (16 MiB scoped default,
# raised explicitly), v6e (128 MiB phys) and v7x (64 MiB phys per TensorCore).
_VMEM_TILE_BUDGET_BYTES = 24 * 1024 * 1024
_VMEM_LIMIT_BYTES = 40 * 1024 * 1024
_MAX_TILE_ROWS = 1024        # >=512 rows already reaches ~85% of HBM roofline


def _round_up(x: int, m: int) -> int:
    return ((x + m - 1) // m) * m


def _round_down(x: int, m: int) -> int:
    return (x // m) * m


def _sublane_align(*dtypes) -> int:
    """Native sublane count: 8 for 4-byte, 16 for 2-byte, 32 for 1-byte dtypes."""
    a = 8
    for dt in dtypes:
        a = max(a, 32 // jnp.dtype(dt).itemsize)
    return a


def _pick_tile_s(S: int, pipelined_row_bytes: int, live_row_bytes: int, align: int) -> int:
    """Tile rows: dtype-aligned, VMEM-budgeted (incl. live temps), >=2 grid steps."""
    if S <= align:
        return S                                   # full-dim block is always legal
    cap = min(S, _MAX_TILE_ROWS)
    # >=2 grid steps so double-buffering overlaps DMA and v7x can shard the
    # parallel axis across both TensorCores; aim for >=8 steps once tiles can
    # stay >=512 rows.
    cap = min(cap, _round_up(pl.cdiv(S, 2), align))
    if S >= 8 * 512:
        cap = min(cap, max(512, _round_up(pl.cdiv(S, 8), align)))
    t = max(_round_down(cap, align), align)
    # Double-buffered pipelined operands + ~1 tile of in-kernel temporaries.
    while t > align and (2 * t * pipelined_row_bytes + t * live_row_bytes) > _VMEM_TILE_BUDGET_BYTES:
        t -= align
    return t


def positional_encoding_forward(
    x: jax.Array,
    pe: jax.Array,
    *,
    p: float = 0.1,
    train: bool = False,
    seed: int = 0,
    tile_s: int | None = None,
    donate_x: bool = False,
) -> jax.Array:
    """x: (S, B, D); pe: (max_len, 1, D).  Returns (S, B, D)."""
    S, B, D = x.shape
    max_len = pe.shape[0]
    assert S <= max_len, f"seq_len {S} exceeds positional-encoding max_len {max_len}"

    use_dropout = bool(train) and float(p) > 0.0

    # Lane-dense views (plain-JAX glue: contiguous reshape / static slice).
    # Note: lane width B*D (ideally D) being a multiple of 128 gives unmasked
    # stores; smaller widths (like the demo shape) are correct but slower.
    x2 = x.reshape(S, B * D)                       # (S, B*D)
    pe2 = pe[:S, 0, :].astype(x.dtype)             # (S, D), cast once here

    itemsize = x.dtype.itemsize
    x_row = B * D * itemsize                       # bytes per row of x / out
    pe_row = D * itemsize
    bits_row = B * D if use_dropout else 0         # uint8 bits, 1 byte/elem

    align = _sublane_align(x.dtype, *((jnp.uint8,) if use_dropout else ()))
    if tile_s is None:
        pipelined = 2 * x_row + pe_row + bits_row  # in + out + pe (+ bits)
        tile_s = _pick_tile_s(S, pipelined, x_row, align)

    grid = (pl.cdiv(S, tile_s),)                   # ragged last block OK (elementwise)

    inputs = [x2, pe2]
    in_specs = [
        pl.BlockSpec((tile_s, B * D), lambda i: (i, 0)),
        pl.BlockSpec((tile_s, D), lambda i: (i, 0)),
    ]
    if use_dropout:
        # TODO(synk): torch-bit-identical dropout RNG is not reproducible; this
        # uses jax.random uint8 bits (8-bit drop-probability resolution).
        bits2 = jax.random.bits(jax.random.PRNGKey(seed), (S, B * D), dtype=jnp.uint8)
        inputs.append(bits2)
        in_specs.append(pl.BlockSpec((tile_s, B * D), lambda i: (i, 0)))

    kernel = functools.partial(
        _pe_kernel, batch=B, d_model=D, p=float(p), train=use_dropout
    )

    out2 = pl.pallas_call(
        kernel,
        out_shape=jax.ShapeDtypeStruct((S, B * D), x.dtype),
        grid=grid,
        in_specs=in_specs,
        out_specs=pl.BlockSpec((tile_s, B * D), lambda i: (i, 0)),
        input_output_aliases=({0: 0} if donate_x else {}),
        compiler_params=pltpu.CompilerParams(
            # Independent tiles: "parallel" lets v7x shard across both TCs.
            dimension_semantics=("parallel",),
            vmem_limit_bytes=_VMEM_LIMIT_BYTES,
        ),
    )(*inputs)

    return out2.reshape(S, B, D)


if __name__ == "__main__":
    # Small, module-consistent shapes: seq=8, batch=2, d_model=32.
    S, B, D = 8, 2, 32
    MAX_LEN = 64

    key = jax.random.PRNGKey(0)
    x = jax.random.normal(key, (S, B, D), dtype=jnp.float32)
    pe = make_pe_table(D, MAX_LEN)

    # Eval-mode forward (dropout = identity), deterministic.
    out = positional_encoding_forward(x, pe, p=0.1, train=False)
    out = jax.block_until_ready(out)

    ref = x + pe[:S]
    assert out.shape == (S, B, D)
    assert out.dtype == jnp.float32
    assert jnp.allclose(out, ref, atol=1e-6), "mismatch vs reference (eval path)"

    # Train-mode forward: every element is either 0 (dropped) or ref/(1-p).
    p_drop = 0.1
    out_t = positional_encoding_forward(x, pe, p=p_drop, train=True, seed=123)
    out_t = jax.block_until_ready(out_t)
    scaled = ref / (1.0 - p_drop)
    ok = jnp.isclose(out_t, 0.0, atol=1e-6) | jnp.isclose(
        out_t, scaled, rtol=1e-5, atol=1e-5
    )
    assert bool(jnp.all(ok)), "train path produced values outside {0, ref/(1-p)}"

    print("KERNEL_OK")
</pallas_src>

<mosaic_0001>
module attributes {stable_mosaic.version = 11 : i64} {
  func.func @_pe_kernel(%arg0: i32, %arg1: memref<8x64xf32, #tpu.memory_space<vmem>>, %arg2: memref<8x32xf32, #tpu.memory_space<vmem>>, %arg3: memref<8x64xf32, #tpu.memory_space<vmem>>) attributes {dimension_semantics = [#tpu.dimension_semantics<parallel>], iteration_bounds = array<i64: 1>, scalar_prefetch = 0 : i64, scratch_operands = 0 : i64, tpu.core_type = #tpu.core_type<tc>, window_params = [{transform_indices = @transform_0, window_bounds = array<i64: 8, 64>}, {transform_indices = @transform_1, window_bounds = array<i64: 8, 32>}, {transform_indices = @transform_2, window_bounds = array<i64: 8, 64>}]} {
    %c0 = arith.constant 0 : index
    %c0_0 = arith.constant 0 : index
    %0 = vector.load %arg2[%c0, %c0_0] : memref<8x32xf32, #tpu.memory_space<vmem>>, vector<8x32xf32>
    %c0_1 = arith.constant 0 : index
    %c0_2 = arith.constant 0 : index
    %1 = vector.load %arg1[%c0_1, %c0_2] : memref<8x64xf32, #tpu.memory_space<vmem>>, vector<8x32xf32>
    %2 = arith.addf %1, %0 : vector<8x32xf32>
    %c0_3 = arith.constant 0 : index
    %c0_4 = arith.constant 0 : index
    %3 = vector.load %arg3[%c0_3, %c0_4] : memref<8x64xf32, #tpu.memory_space<vmem>>, vector<8x32xf32>
    tpu.vector_store %arg3[%c0_3, %c0_4], %2 {strides = array<i32>} : memref<8x64xf32, #tpu.memory_space<vmem>>, vector<8x32xf32>,
    %c0_5 = arith.constant 0 : index
    %c32 = arith.constant 32 : index
    %4 = vector.load %arg1[%c0_5, %c32] : memref<8x64xf32, #tpu.memory_space<vmem>>, vector<8x32xf32>
    %5 = arith.addf %4, %0 : vector<8x32xf32>
    %c0_6 = arith.constant 0 : index
    %c32_7 = arith.constant 32 : index
    %6 = vector.load %arg3[%c0_6, %c32_7] : memref<8x64xf32, #tpu.memory_space<vmem>>, vector<8x32xf32>
    tpu.vector_store %arg3[%c0_6, %c32_7], %5 {strides = array<i32>} : memref<8x64xf32, #tpu.memory_space<vmem>>, vector<8x32xf32>,
    return
  }
  func.func @transform_0(%arg0: i32) -> (i32, i32) {
    %c0_i32 = arith.constant 0 : i32
    %c0_i32_0 = arith.constant 0 : i32
    return %arg0, %c0_i32 : i32, i32
  }
  func.func @transform_1(%arg0: i32) -> (i32, i32) {
    %c0_i32 = arith.constant 0 : i32
    %c0_i32_0 = arith.constant 0 : i32
    return %arg0, %c0_i32 : i32, i32
  }
  func.func @transform_2(%arg0: i32) -> (i32, i32) {
    %c0_i32 = arith.constant 0 : i32
    %c0_i32_0 = arith.constant 0 : i32
    return %arg0, %c0_i32 : i32, i32
  }
}

</mosaic_0001>

<bundles_post_ra>
// kernel: tpu_custom_call.1
= control target key start
LH: loop header
LB: loop body
LE: loop exit
PB: predicated region body
PF: predicated region fallthrough
CT: control target
= control target key end

     0   :  { %7 = vsyncpa [#allocation3], 0  ;;  %s181_s0 = inlined_call_operand.hbm [shape: f32[8,64], index: 0, kind: input, shape index: {}]   ;;  %s182_s1 = inlined_call_operand.hbm [shape: f32[8,32], index: 1, kind: input, shape index: {}]   ;;  %s183_s2 = inlined_call_operand.hbm [shape: f32[8,64], index: 2, kind: output, shape index: {}]  }
   0x1   :  { %8 = vsyncpa [#allocation6], 0 }
   0x2   :  { %9 = vsyncpa [#allocation4], 0  ;;  %s15_s11 = sshll.u32 %s181_s0, 4  ;;  %s153_s12 = smov [#allocation2]   ;;  %s16_s11 = int_to_ptr.hbm [resolvable:$true] %s15_s11 }
   0x3   :  { %s17_s13 = sshll.u32 %s153_s12, 4  ;;  %s26_s16 = sshll.u32 %s182_s1, 4  ;;  %s18_s13 = int_to_ptr.vmem [resolvable:$true] %s17_s13  ;;  %s27_s16 = int_to_ptr.hbm [resolvable:$true] %s26_s16 }
   0x4   :  { %20 = dma.hbm_to_vmem [thread:$0]  %s16_s11, 128, %s18_s13, [#allocation3]  }
   0x5   :  { %s154_s17 = smov [#allocation5]  }
   0x6   :  { %s28_s18 = sshll.u32 %s154_s17, 4  ;;  %s29_s18 = int_to_ptr.vmem [resolvable:$true] %s28_s18 }
   0x7   :  { %31 = dma.hbm_to_vmem [thread:$0]  %s27_s16, 128, %s29_s18, [#allocation6]  }
   0x8   :  { %147 = dma.done.wait [#allocation3], 128  }
   0x9   :  { %148 = vsyncadd [#allocation3], 4294967168 }
   0xa   :  { %149 = dma.done.wait [#allocation6], 128  }
   0xb   :  { %150 = vsyncadd [#allocation6], 4294967168  ;;  %v40_v0 = vld [vmem:[#allocation5] sm:$0xff]  ;;  %v41_v1 = vld [vmem:[#allocation2] sm:$0xff]  ;;  %vm43_vm0 = vcmask 261120   ;;  %s155_s0 = smov 32  }
   0xc   :  { %v42_v2 = vadd.f32 %v41_v1, %v40_v0  ;;  %47 = vrot.lane.b32.xlu0 %v40_v0, %s155_s0  ;;  %s156_s19 = smov [#allocation7]   ;;  %s60_s22 = sshll.u32 %s183_s2, 4  ;;  %vm51_vm1 = vcmask 523520   ;;  %s61_s22 = int_to_ptr.hbm [resolvable:$true] %s60_s22 }
   0xd   :  { %s58_s20 = sshll.u32 %s156_s19, 4  ;;  %s59_s20 = int_to_ptr.vmem [resolvable:$true] %s58_s20 }
   0xe   :  { %44 = vst.msk [vmem:[#allocation7] sm:$0xff] %vm43_vm0, %v42_v2 }
  0x7e   :  { %v48_v3 = vpop.permute.xlu0 %47 }
  0x7f   :  { %v50_v4 = vadd.f32 %v48_v3, %v41_v1 }
  0x81   :  { %52 = vst.msk [vmem:[#allocation7] sm:$0xff] %vm51_vm1, %v50_v4 }
  0x82   :  { %63 = dma.vmem_to_hbm [thread:$0]  %s59_s20, 128, %s61_s22, [#allocation4]  }
  0x83   :  { %151 = dma.done.wait [#allocation4], 128  }
  0x84   :  { %152 = vsyncadd [#allocation4], 4294967168 }
  0x85   :  { %68 = vsyncpa [#allocation3], 1 }
  0x86   :  { %69 = vsyncpa [#allocation6], 1 }
  0x87   :  { %70 = vsyncpa [#allocation4], 1 }

</bundles_post_ra>
